<compile_context>
chip_gen: v5e
topology: v5e:2x2
jax: 0.10.0
libtpu: 0.0.40
codegen_flags: <defaults>
</compile_context>

<pallas_src>
import jax
import jax.numpy as jnp
from jax.experimental import pallas as pl
from jax.experimental.pallas import tpu as pltpu

# MLP layer sizes (from NavigationNet.__init__)
LAYER_SIZES = [6, 16, 32, 64, 32, 16, 2]
NUM_LAYERS = len(LAYER_SIZES) - 1
PAD = 128   # packed activation lane width
OFF = 64    # lane offset of the second packed sample (max hidden width = 64)


def navigation_net_kernel(x_ref, w0_ref, wm_ref, w5_ref,
                          b0_ref, bm_ref, b5_ref, o_ref):
    """Full 6-layer MLP forward for one tile of packed rows.

    x_ref : (b_tile, 16)  two samples per row: lanes [0:6) = sample A,
                          lanes [8:14) = sample B, rest zero.
    w0_ref: (16, 128)     bf16; rows [0:6)->lanes [0:16), rows [8:14)->[64:80).
    wm_ref: (4, 128, 128) bf16 blockdiag(W, W) slabs for the hidden layers.
    w5_ref: (128, 8)      bf16; A outputs -> lanes [0:2), B outputs -> [2:4).
    b*_ref: f32 biases, replicated per packed sample; zero elsewhere.
    o_ref : (b_tile, 8)   f32 packed output.
    """
    # Layer 0: narrow-K matmul lifts both packed samples into one 128-lane row.
    h = jnp.tanh(
        jnp.dot(x_ref[...].astype(jnp.bfloat16), w0_ref[...],
                preferred_element_type=jnp.float32)
        + b0_ref[...]
    )
    # Layers 1..4: (b_tile,128) @ blockdiag(W, W).  Padded lanes stay 0
    # (zero weight rows/cols, zero bias, tanh(0) = 0).
    for l in range(NUM_LAYERS - 2):
        h = jnp.tanh(
            jnp.dot(h.astype(jnp.bfloat16), wm_ref[l],
                    preferred_element_type=jnp.float32)
            + bm_ref[l]
        )
    # Layer 5: narrow-N matmul; result is already lane-contiguous in 8 lanes.
    h = jnp.tanh(
        jnp.dot(h.astype(jnp.bfloat16), w5_ref[...],
                preferred_element_type=jnp.float32)
        + b5_ref[...]
    )
    o_ref[...] = h.astype(o_ref.dtype)


def make_params(key):
    """Deterministic init matching nn.Linear shapes.

    Returns:
      params: dict of packed kernel parameters (bf16 weights, f32 biases).
      raw:    list of (w, b) un-padded f32 params for the pure-JAX reference.
    """
    keys = jax.random.split(key, NUM_LAYERS)
    raw = []
    for k, fan_in, fan_out in zip(keys, LAYER_SIZES[:-1], LAYER_SIZES[1:]):
        kw, kb = jax.random.split(k)
        bound = 1.0 / float(fan_in) ** 0.5
        # stored as (in, out) so the kernel computes x @ W + b
        w = jax.random.uniform(kw, (fan_in, fan_out), jnp.float32, -bound, bound)
        b = jax.random.uniform(kb, (fan_out,), jnp.float32, -bound, bound)
        raw.append((w, b))

    # Layer 0: sample A features rows [0:6) -> lanes [0:16);
    #          sample B features rows [8:14) -> lanes [64:80).
    w0, b0 = raw[0]
    w0p = jnp.zeros((16, PAD), jnp.float32)
    w0p = w0p.at[0:6, 0:16].set(w0).at[8:14, OFF:OFF + 16].set(w0)
    b0p = jnp.zeros((1, PAD), jnp.float32)
    b0p = b0p.at[0, 0:16].set(b0).at[0, OFF:OFF + 16].set(b0)

    # Layers 1..4: blockdiag(W, W) in a (128,128) slab; bias replicated.
    wmp = jnp.zeros((NUM_LAYERS - 2, PAD, PAD), jnp.float32)
    bmp = jnp.zeros((NUM_LAYERS - 2, 1, PAD), jnp.float32)
    for i, l in enumerate(range(1, NUM_LAYERS - 1)):
        w, b = raw[l]
        ni, no = LAYER_SIZES[l], LAYER_SIZES[l + 1]
        wmp = wmp.at[i, 0:ni, 0:no].set(w)
        wmp = wmp.at[i, OFF:OFF + ni, OFF:OFF + no].set(w)
        bmp = bmp.at[i, 0, 0:no].set(b)
        bmp = bmp.at[i, 0, OFF:OFF + no].set(b)

    # Layer 5: sample A outputs -> lanes [0:2), sample B outputs -> [2:4).
    w5, b5 = raw[-1]
    w5p = jnp.zeros((PAD, 8), jnp.float32)
    w5p = w5p.at[0:16, 0:2].set(w5).at[OFF:OFF + 16, 2:4].set(w5)
    b5p = jnp.zeros((1, 8), jnp.float32)
    b5p = b5p.at[0, 0:2].set(b5).at[0, 2:4].set(b5)

    params = dict(
        w0=w0p.astype(jnp.bfloat16),
        wm=wmp.astype(jnp.bfloat16),
        w5=w5p.astype(jnp.bfloat16),
        b0=b0p, bm=bmp, b5=b5p,
    )
    return params, raw


def navigation_net_forward(x, params, *, max_rows_per_tile=2048):
    """Pallas forward pass.  x: (B, 6) f32 -> (B, 2) f32."""
    B, d_in = x.shape
    assert d_in == LAYER_SIZES[0], d_in

    # Two samples per packed 128-lane row.
    rows = (B + 1) // 2
    rows8 = ((rows + 7) // 8) * 8
    b_tile = min(max_rows_per_tile, rows8)
    # v7x megacore: if everything fits in one tile but there is real work,
    # split into two grid steps so the "parallel" axis feeds both TensorCores.
    if b_tile == rows8 and rows8 >= 256:
        b_tile = ((rows8 // 2 + 7) // 8) * 8
    rows_pad = ((rows8 + b_tile - 1) // b_tile) * b_tile

    # Pack: pad each sample's 6 features to 8 lanes, pad batch to 2*rows_pad,
    # then pair consecutive samples into one 16-lane row.  (Padded batch rows
    # compute tanh(bias) garbage and are sliced off below.)
    x_p = jnp.pad(x.astype(jnp.float32), ((0, 2 * rows_pad - B), (0, 2)))
    x_pack = x_p.reshape(rows_pad, 16)

    grid = (rows_pad // b_tile,)

    w_bytes = (params["w0"].size + params["wm"].size + params["w5"].size) * 2
    b_bytes = (params["b0"].size + params["bm"].size + params["b5"].size) * 4
    cost = pl.CostEstimate(
        flops=2 * rows_pad * (16 * PAD + (NUM_LAYERS - 2) * PAD * PAD + PAD * 8),
        transcendentals=rows_pad * ((NUM_LAYERS - 1) * PAD + 8),
        bytes_accessed=rows_pad * 16 * 4 + rows_pad * 8 * 4 + w_bytes + b_bytes,
    )

    out = pl.pallas_call(
        navigation_net_kernel,
        out_shape=jax.ShapeDtypeStruct((rows_pad, 8), jnp.float32),
        grid=grid,
        in_specs=[
            # batch-tiled, narrow (16-lane) packed input: pipelined per tile
            pl.BlockSpec((b_tile, 16), lambda i: (i, 0)),
            # parameter slabs: full-array blocks, resident across the grid
            pl.BlockSpec((16, PAD), lambda i: (0, 0)),
            pl.BlockSpec((NUM_LAYERS - 2, PAD, PAD), lambda i: (0, 0, 0)),
            pl.BlockSpec((PAD, 8), lambda i: (0, 0)),
            pl.BlockSpec((1, PAD), lambda i: (0, 0)),
            pl.BlockSpec((NUM_LAYERS - 2, 1, PAD), lambda i: (0, 0, 0)),
            pl.BlockSpec((1, 8), lambda i: (0, 0)),
        ],
        # narrow (8-lane) output block: 16x less HBM write traffic than 128-wide
        out_specs=pl.BlockSpec((b_tile, 8), lambda i: (i, 0)),
        compiler_params=pltpu.CompilerParams(
            dimension_semantics=("parallel",),  # shard batch tiles across TCs
        ),
        cost_estimate=cost,
    )(x_pack, params["w0"], params["wm"], params["w5"],
      params["b0"], params["bm"], params["b5"])

    # Unpack: lanes [0:2) = even samples, lanes [2:4) = odd samples.
    return out[:, :4].reshape(2 * rows_pad, 2)[:B]


def navigation_net_ref(x, raw_params):
    """Pure-JAX f32 reference (unpadded) for correctness checking."""
    h = x
    for w, b in raw_params:
        h = jnp.tanh(h @ w + b)
    return h


if __name__ == "__main__":
    key = jax.random.PRNGKey(0)
    k_params, k_x = jax.random.split(key)

    params, raw_params = make_params(k_params)

    # current_state: (batch, 6) — e.g. position/velocity/goal features
    batch = 8
    x = jax.random.normal(k_x, (batch, 6), jnp.float32)

    out = navigation_net_forward(x, params)
    out = jax.block_until_ready(out)

    ref = navigation_net_ref(x, raw_params)
    assert out.shape == (batch, 2), out.shape
    max_err = float(jnp.max(jnp.abs(out - ref)))
    # bf16 matmul operands vs f32 reference -> relaxed tolerance (outputs are
    # in [-1, 1] after the final tanh).
    assert max_err < 2e-2, f"mismatch vs reference: max abs diff = {max_err:e}"

    print("KERNEL_OK")
</pallas_src>

<mosaic_0001>
module attributes {stable_mosaic.version = 11 : i64} {
  func.func @navigation_net_kernel(%arg0: i32, %arg1: memref<8x16xf32, #tpu.memory_space<vmem>>, %arg2: memref<16x128xbf16, #tpu.memory_space<vmem>>, %arg3: memref<4x128x128xbf16, #tpu.memory_space<vmem>>, %arg4: memref<128x8xbf16, #tpu.memory_space<vmem>>, %arg5: memref<1x128xf32, #tpu.memory_space<vmem>>, %arg6: memref<4x1x128xf32, #tpu.memory_space<vmem>>, %arg7: memref<1x8xf32, #tpu.memory_space<vmem>>, %arg8: memref<8x8xf32, #tpu.memory_space<vmem>>) attributes {dimension_semantics = [#tpu.dimension_semantics<parallel>], iteration_bounds = array<i64: 1>, scalar_prefetch = 0 : i64, scratch_operands = 0 : i64, tpu.core_type = #tpu.core_type<tc>, window_params = [{transform_indices = @transform_0, window_bounds = array<i64: 8, 16>}, {pipeline_mode = #tpu.pipeline_mode<synchronous>, transform_indices = @transform_1, window_bounds = array<i64: 16, 128>}, {pipeline_mode = #tpu.pipeline_mode<synchronous>, transform_indices = @transform_2, window_bounds = array<i64: 4, 128, 128>}, {pipeline_mode = #tpu.pipeline_mode<synchronous>, transform_indices = @transform_3, window_bounds = array<i64: 128, 8>}, {pipeline_mode = #tpu.pipeline_mode<synchronous>, transform_indices = @transform_4, window_bounds = array<i64: 1, 128>}, {pipeline_mode = #tpu.pipeline_mode<synchronous>, transform_indices = @transform_5, window_bounds = array<i64: 4, 1, 128>}, {pipeline_mode = #tpu.pipeline_mode<synchronous>, transform_indices = @transform_6, window_bounds = array<i64: 1, 8>}, {transform_indices = @transform_7, window_bounds = array<i64: 8, 8>}]} {
    %c0 = arith.constant 0 : index
    %c0_0 = arith.constant 0 : index
    %0 = vector.load %arg1[%c0, %c0_0] : memref<8x16xf32, #tpu.memory_space<vmem>>, vector<8x16xf32>
    %1 = arith.truncf %0 : vector<8x16xf32> to vector<8x16xbf16>
    %c0_1 = arith.constant 0 : index
    %c0_2 = arith.constant 0 : index
    %2 = vector.load %arg2[%c0_1, %c0_2] : memref<16x128xbf16, #tpu.memory_space<vmem>>, vector<16x128xbf16>
    %cst = arith.constant dense<0.000000e+00> : vector<8x128xf32>
    %3 = tpu.matmul %1, %2, %cst {dimension_numbers = #tpu.dot_dimension_numbers<[1], [0], [0], [1], [0, 0, 1, 1], [], []>} : vector<8x16xbf16>, vector<16x128xbf16>, vector<8x128xf32> -> vector<8x128xf32>
    %c0_3 = arith.constant 0 : index
    %c0_4 = arith.constant 0 : index
    %4 = vector.load %arg5[%c0_3, %c0_4] : memref<1x128xf32, #tpu.memory_space<vmem>>, vector<1x128xf32>
    %5 = vector.broadcast %4 : vector<1x128xf32> to vector<8x128xf32>
    %6 = arith.addf %3, %5 : vector<8x128xf32>
    %7 = math.tanh %6 : vector<8x128xf32>
    %8 = arith.truncf %7 : vector<8x128xf32> to vector<8x128xbf16>
    %c0_5 = arith.constant 0 : index
    %c0_6 = arith.constant 0 : index
    %c0_7 = arith.constant 0 : index
    %9 = vector.load %arg3[%c0_5, %c0_6, %c0_7] : memref<4x128x128xbf16, #tpu.memory_space<vmem>>, vector<1x128x128xbf16>
    %10 = vector.shape_cast %9 : vector<1x128x128xbf16> to vector<128x128xbf16>
    %cst_8 = arith.constant dense<0.000000e+00> : vector<8x128xf32>
    %11 = tpu.matmul %8, %10, %cst_8 {dimension_numbers = #tpu.dot_dimension_numbers<[1], [0], [0], [1], [0, 0, 1, 1], [], []>} : vector<8x128xbf16>, vector<128x128xbf16>, vector<8x128xf32> -> vector<8x128xf32>
    %c0_9 = arith.constant 0 : index
    %c0_10 = arith.constant 0 : index
    %c0_11 = arith.constant 0 : index
    %12 = vector.load %arg6[%c0_9, %c0_10, %c0_11] : memref<4x1x128xf32, #tpu.memory_space<vmem>>, vector<1x1x128xf32>
    %13 = vector.shape_cast %12 : vector<1x1x128xf32> to vector<1x128xf32>
    %14 = vector.broadcast %13 : vector<1x128xf32> to vector<8x128xf32>
    %15 = arith.addf %11, %14 : vector<8x128xf32>
    %16 = math.tanh %15 : vector<8x128xf32>
    %17 = arith.truncf %16 : vector<8x128xf32> to vector<8x128xbf16>
    %c1 = arith.constant 1 : index
    %c0_12 = arith.constant 0 : index
    %c0_13 = arith.constant 0 : index
    %18 = vector.load %arg3[%c1, %c0_12, %c0_13] : memref<4x128x128xbf16, #tpu.memory_space<vmem>>, vector<1x128x128xbf16>
    %19 = vector.shape_cast %18 : vector<1x128x128xbf16> to vector<128x128xbf16>
    %cst_14 = arith.constant dense<0.000000e+00> : vector<8x128xf32>
    %20 = tpu.matmul %17, %19, %cst_14 {dimension_numbers = #tpu.dot_dimension_numbers<[1], [0], [0], [1], [0, 0, 1, 1], [], []>} : vector<8x128xbf16>, vector<128x128xbf16>, vector<8x128xf32> -> vector<8x128xf32>
    %c1_15 = arith.constant 1 : index
    %c0_16 = arith.constant 0 : index
    %c0_17 = arith.constant 0 : index
    %21 = vector.load %arg6[%c1_15, %c0_16, %c0_17] : memref<4x1x128xf32, #tpu.memory_space<vmem>>, vector<1x1x128xf32>
    %22 = vector.shape_cast %21 : vector<1x1x128xf32> to vector<1x128xf32>
    %23 = vector.broadcast %22 : vector<1x128xf32> to vector<8x128xf32>
    %24 = arith.addf %20, %23 : vector<8x128xf32>
    %25 = math.tanh %24 : vector<8x128xf32>
    %26 = arith.truncf %25 : vector<8x128xf32> to vector<8x128xbf16>
    %c2 = arith.constant 2 : index
    %c0_18 = arith.constant 0 : index
    %c0_19 = arith.constant 0 : index
    %27 = vector.load %arg3[%c2, %c0_18, %c0_19] : memref<4x128x128xbf16, #tpu.memory_space<vmem>>, vector<1x128x128xbf16>
    %28 = vector.shape_cast %27 : vector<1x128x128xbf16> to vector<128x128xbf16>
    %cst_20 = arith.constant dense<0.000000e+00> : vector<8x128xf32>
    %29 = tpu.matmul %26, %28, %cst_20 {dimension_numbers = #tpu.dot_dimension_numbers<[1], [0], [0], [1], [0, 0, 1, 1], [], []>} : vector<8x128xbf16>, vector<128x128xbf16>, vector<8x128xf32> -> vector<8x128xf32>
    %c2_21 = arith.constant 2 : index
    %c0_22 = arith.constant 0 : index
    %c0_23 = arith.constant 0 : index
    %30 = vector.load %arg6[%c2_21, %c0_22, %c0_23] : memref<4x1x128xf32, #tpu.memory_space<vmem>>, vector<1x1x128xf32>
    %31 = vector.shape_cast %30 : vector<1x1x128xf32> to vector<1x128xf32>
    %32 = vector.broadcast %31 : vector<1x128xf32> to vector<8x128xf32>
    %33 = arith.addf %29, %32 : vector<8x128xf32>
    %34 = math.tanh %33 : vector<8x128xf32>
    %35 = arith.truncf %34 : vector<8x128xf32> to vector<8x128xbf16>
    %c3 = arith.constant 3 : index
    %c0_24 = arith.constant 0 : index
    %c0_25 = arith.constant 0 : index
    %36 = vector.load %arg3[%c3, %c0_24, %c0_25] : memref<4x128x128xbf16, #tpu.memory_space<vmem>>, vector<1x128x128xbf16>
    %37 = vector.shape_cast %36 : vector<1x128x128xbf16> to vector<128x128xbf16>
    %cst_26 = arith.constant dense<0.000000e+00> : vector<8x128xf32>
    %38 = tpu.matmul %35, %37, %cst_26 {dimension_numbers = #tpu.dot_dimension_numbers<[1], [0], [0], [1], [0, 0, 1, 1], [], []>} : vector<8x128xbf16>, vector<128x128xbf16>, vector<8x128xf32> -> vector<8x128xf32>
    %c3_27 = arith.constant 3 : index
    %c0_28 = arith.constant 0 : index
    %c0_29 = arith.constant 0 : index
    %39 = vector.load %arg6[%c3_27, %c0_28, %c0_29] : memref<4x1x128xf32, #tpu.memory_space<vmem>>, vector<1x1x128xf32>
    %40 = vector.shape_cast %39 : vector<1x1x128xf32> to vector<1x128xf32>
    %41 = vector.broadcast %40 : vector<1x128xf32> to vector<8x128xf32>
    %42 = arith.addf %38, %41 : vector<8x128xf32>
    %43 = math.tanh %42 : vector<8x128xf32>
    %44 = arith.truncf %43 : vector<8x128xf32> to vector<8x128xbf16>
    %c0_30 = arith.constant 0 : index
    %c0_31 = arith.constant 0 : index
    %45 = vector.load %arg4[%c0_30, %c0_31] : memref<128x8xbf16, #tpu.memory_space<vmem>>, vector<128x8xbf16>
    %cst_32 = arith.constant dense<0.000000e+00> : vector<8x8xf32>
    %46 = tpu.matmul %44, %45, %cst_32 {dimension_numbers = #tpu.dot_dimension_numbers<[1], [0], [0], [1], [0, 0, 1, 1], [], []>} : vector<8x128xbf16>, vector<128x8xbf16>, vector<8x8xf32> -> vector<8x8xf32>
    %c0_33 = arith.constant 0 : index
    %c0_34 = arith.constant 0 : index
    %47 = vector.load %arg7[%c0_33, %c0_34] : memref<1x8xf32, #tpu.memory_space<vmem>>, vector<1x8xf32>
    %48 = vector.broadcast %47 : vector<1x8xf32> to vector<8x8xf32>
    %49 = arith.addf %46, %48 : vector<8x8xf32>
    %50 = math.tanh %49 : vector<8x8xf32>
    %c0_35 = arith.constant 0 : index
    %c0_36 = arith.constant 0 : index
    %51 = vector.load %arg8[%c0_35, %c0_36] : memref<8x8xf32, #tpu.memory_space<vmem>>, vector<8x8xf32>
    tpu.vector_store %arg8[%c0_35, %c0_36], %50 {strides = array<i32>} : memref<8x8xf32, #tpu.memory_space<vmem>>, vector<8x8xf32>,
    return
  }
  func.func @transform_0(%arg0: i32) -> (i32, i32) {
    %c0_i32 = arith.constant 0 : i32
    %c0_i32_0 = arith.constant 0 : i32
    return %arg0, %c0_i32 : i32, i32
  }
  func.func @transform_1(%arg0: i32) -> (i32, i32) {
    %c0_i32 = arith.constant 0 : i32
    %c0_i32_0 = arith.constant 0 : i32
    %c0_i32_1 = arith.constant 0 : i32
    return %c0_i32, %c0_i32_0 : i32, i32
  }
  func.func @transform_2(%arg0: i32) -> (i32, i32, i32) {
    %c0_i32 = arith.constant 0 : i32
    %c0_i32_0 = arith.constant 0 : i32
    %c0_i32_1 = arith.constant 0 : i32
    %c0_i32_2 = arith.constant 0 : i32
    return %c0_i32, %c0_i32_0, %c0_i32_1 : i32, i32, i32
  }
  func.func @transform_3(%arg0: i32) -> (i32, i32) {
    %c0_i32 = arith.constant 0 : i32
    %c0_i32_0 = arith.constant 0 : i32
    %c0_i32_1 = arith.constant 0 : i32
    return %c0_i32, %c0_i32_0 : i32, i32
  }
  func.func @transform_4(%arg0: i32) -> (i32, i32) {
    %c0_i32 = arith.constant 0 : i32
    %c0_i32_0 = arith.constant 0 : i32
    %c0_i32_1 = arith.constant 0 : i32
    return %c0_i32, %c0_i32_0 : i32, i32
  }
  func.func @transform_5(%arg0: i32) -> (i32, i32, i32) {
    %c0_i32 = arith.constant 0 : i32
    %c0_i32_0 = arith.constant 0 : i32
    %c0_i32_1 = arith.constant 0 : i32
    %c0_i32_2 = arith.constant 0 : i32
    return %c0_i32, %c0_i32_0, %c0_i32_1 : i32, i32, i32
  }
  func.func @transform_6(%arg0: i32) -> (i32, i32) {
    %c0_i32 = arith.constant 0 : i32
    %c0_i32_0 = arith.constant 0 : i32
    %c0_i32_1 = arith.constant 0 : i32
    return %c0_i32, %c0_i32_0 : i32, i32
  }
  func.func @transform_7(%arg0: i32) -> (i32, i32) {
    %c0_i32 = arith.constant 0 : i32
    %c0_i32_0 = arith.constant 0 : i32
    return %arg0, %c0_i32 : i32, i32
  }
}

</mosaic_0001>

<bundles_post_ra>
// kernel: tpu_custom_call.1
= control target key start
LH: loop header
LB: loop body
LE: loop exit
PB: predicated region body
PF: predicated region fallthrough
CT: control target
= control target key end

     0   :  { %12 = vsyncpa [#allocation3], 0  ;;  %s897_s0 = inlined_call_operand.vmem [shape: f32[8,16], index: 0, kind: input, shape index: {}]   ;;  %s898_s1 = inlined_call_operand.vmem [shape: bf16[16,128], index: 1, kind: input, shape index: {}]   ;;  %s899_s2 = inlined_call_operand.hbm [shape: bf16[4,128,128], index: 2, kind: input, shape index: {}]   ;;  %s900_s3 = inlined_call_operand.vmem [shape: bf16[128,8], index: 3, kind: input, shape index: {}]   ;;  %s901_s4 = inlined_call_operand.vmem [shape: f32[1,128], index: 4, kind: input, shape index: {}]   ;;  %s902_s5 = inlined_call_operand.vmem [shape: f32[4,1,128], index: 5, kind: input, shape index: {}]   ;;  %s903_s6 = inlined_call_operand.vmem [shape: f32[1,8], index: 6, kind: input, shape index: {}]   ;;  %s904_s7 = inlined_call_operand.hbm [shape: f32[8,8], index: 7, kind: output, shape index: {}]  }
   0x1   :  { %13 = vsyncpa [#allocation4], 0  ;;  %s22_s26 = sshll.u32 %s899_s2, 4  ;;  %s799_s27 = smov [#allocation2]   ;;  %s23_s26 = int_to_ptr.hbm [resolvable:$true] %s22_s26 }
   0x2   :  { %s24_s28 = sshll.u32 %s799_s27, 4  ;;  %s800_s29 = smov 64   ;;  %s25_s28 = int_to_ptr.vmem [resolvable:$true] %s24_s28 }
   0x3   :  { %s801_s30 = smov 4  }
   0x4   :  { %30 = dma.hbm_to_vmem [thread:$0]  %s23_s26, 4096, %s25_s28, [#allocation3], %s800_s29, %s800_s29, %s801_s30  }
   0x5   :  { %795 = dma.done.wait [#allocation3], 4096  }
   0x6   :  { %796 = vsyncadd [#allocation3], 4294963200  ;;  %v684_v0 = vld [vmem:[%s898_s1] sm:$0xff]  ;;  %v692_v2 = vld [vmem:[#allocation2 + $0x38] sm:$0xff]  ;;  %vm58_vm0 = vcmask 130048   ;;  %vm497_vm1 = vcmask 64512  }
   0x7   :  { %v44_v1 = vld [vmem:[%s897_s0] sm:$0xff]  ;;  %69 = vmatpush.bf16.msra.mxu0 %v684_v0  ;;  %145 = vmatpush.bf16.msra.mxu1 %v692_v2  ;;  %v691_v4 = vld [vmem:[#allocation2 + $0x30] sm:$0xff]  ;;  %v690_v5 = vld [vmem:[#allocation2 + $0x28] sm:$0xff] }
   0x8   :  { %v45_v3 = vpack.c.bf16 %v44_v1, %v44_v1  ;;  %v689_v6 = vld [vmem:[#allocation2 + $0x20] sm:$0xff]  ;;  %v688_v7 = vld [vmem:[#allocation2 + $0x18] sm:$0xff]  ;;  %v687_v8 = vld [vmem:[#allocation2 + $0x10] sm:$0xff] }
   0x9   :  { %v686_v9 = vld [vmem:[#allocation2 + $0x8] sm:$0xff]  ;;  %v685_v10 = vld [vmem:[#allocation2] sm:$0xff]  ;;  %v700_v11 = vld [vmem:[#allocation2 + $0x78] sm:$0xff] }
   0xa   :  { %520 = vmatmul.msk.bf16.vlgmr.msra.gmra.mxu0 %vm58_vm0, %v45_v3  ;;  %230 = vmatpush.bf16.msra.mxu2 %v700_v11  ;;  %v699_v12 = vld [vmem:[#allocation2 + $0x70] sm:$0xff]  ;;  %v698_v13 = vld [vmem:[#allocation2 + $0x68] sm:$0xff]  ;;  %v697_v14 = vld [vmem:[#allocation2 + $0x60] sm:$0xff] }
   0xb   :  { %146 = vmatpush.bf16.msra.mxu1 %v691_v4  ;;  %v696_v15 = vld [vmem:[#allocation2 + $0x58] sm:$0xff]  ;;  %v729_v16 = vld [vmem:[%s901_s4] ss:$0 sm:$0xff]  ;;  %v695_v22 = vld [vmem:[#allocation2 + $0x50] sm:$0xff] }
   0xc   :  { %v694_v23 = vld [vmem:[#allocation2 + $0x48] sm:$0xff]  ;;  %v693_v24 = vld [vmem:[#allocation2 + $0x40] sm:$0xff]  ;;  %v708_v25 = vld [vmem:[#allocation2 + $0xb8] sm:$0xff] }
   0xd   :  { %315 = vmatpush.bf16.msra.mxu3 %v708_v25  ;;  %v707_v26 = vld [vmem:[#allocation2 + $0xb0] sm:$0xff]  ;;  %v706_v27 = vld [vmem:[#allocation2 + $0xa8] sm:$0xff]  ;;  %v705_v28 = vld [vmem:[#allocation2 + $0xa0] sm:$0xff] }
   0xe   :  { %231 = vmatpush.bf16.msra.mxu2 %v699_v12  ;;  %v704_v29 = vld [vmem:[#allocation2 + $0x98] sm:$0xff]  ;;  %v730_v30 = vld [vmem:[%s902_s5] ss:$0 sm:$0xff]  ;;  %v703_v36 = vld [vmem:[#allocation2 + $0x90] sm:$0xff] }
   0xf   :  { %147 = vmatpush.bf16.msra.mxu1 %v690_v5  ;;  %v702_v37 = vld [vmem:[#allocation2 + $0x88] sm:$0xff]  ;;  %v701_v38 = vld [vmem:[#allocation2 + $0x80] sm:$0xff]  ;;  %v716_v39 = vld [vmem:[#allocation2 + $0xf8] sm:$0xff] }
  0x10   :  { %400 = vmatpush.bf16.msrb.mxu0 %v716_v39  ;;  %v715_v40 = vld [vmem:[#allocation2 + $0xf0] sm:$0xff]  ;;  %v714_v41 = vld [vmem:[#allocation2 + $0xe8] sm:$0xff]  ;;  %v713_v42 = vld [vmem:[#allocation2 + $0xe0] sm:$0xff] }
  0x11   :  { %316 = vmatpush.bf16.msra.mxu3 %v707_v26  ;;  %v712_v43 = vld [vmem:[#allocation2 + $0xd8] sm:$0xff]  ;;  %v731_v44 = vld [vmem:[%s902_s5 + $0x1] ss:$0 sm:$0xff]  ;;  %v711_v50 = vld [vmem:[#allocation2 + $0xd0] sm:$0xff] }
  0x12   :  { %232 = vmatpush.bf16.msra.mxu2 %v698_v13  ;;  %v710_v51 = vld [vmem:[#allocation2 + $0xc8] sm:$0xff]  ;;  %v709_v52 = vld [vmem:[#allocation2 + $0xc0] sm:$0xff]  ;;  %v724_v53 = vld [vmem:[%s900_s3 + $0x38] sm:$0xff] }
  0x13   :  { %148 = vmatpush.bf16.msra.mxu1 %v689_v6  ;;  %v723_v54 = vld [vmem:[%s900_s3 + $0x30] sm:$0xff]  ;;  %v722_v55 = vld [vmem:[%s900_s3 + $0x28] sm:$0xff]  ;;  %v721_v56 = vld [vmem:[%s900_s3 + $0x20] sm:$0xff] }
  0x14   :  { %401 = vmatpush.bf16.msrb.mxu0 %v715_v40  ;;  %v720_v57 = vld [vmem:[%s900_s3 + $0x18] sm:$0xff]  ;;  %v732_v58 = vld [vmem:[%s902_s5 + $0x2] ss:$0 sm:$0xff]  ;;  %v719_v0 = vld [vmem:[%s900_s3 + $0x10] sm:$0xff] }
  0x15   :  { %317 = vmatpush.bf16.msra.mxu3 %v706_v27  ;;  %v718_v1 = vld [vmem:[%s900_s3 + $0x8] sm:$0xff]  ;;  %v717_v2 = vld [vmem:[%s900_s3] sm:$0xff]  ;;  %s802_s3 = smov [#allocation5]  }
  0x16   :  { %233 = vmatpush.bf16.msra.mxu2 %v697_v14  ;;  %v733_v3 = vld [vmem:[%s902_s5 + $0x3] ss:$0 sm:$0xff]  ;;  %s504_s1 = sshll.u32 %s802_s3, 4  ;;  %s506_s5 = sshll.u32 %s904_s7, 4  ;;  %s505_s1 = int_to_ptr.vmem [resolvable:$true] %s504_s1  ;;  %s507_s5 = int_to_ptr.hbm [resolvable:$true] %s506_s5 }
  0x17   :  { %149 = vmatpush.bf16.msra.mxu1 %v688_v7 }
  0x18   :  { %402 = vmatpush.bf16.msrb.mxu0 %v714_v41 }
  0x19   :  { %318 = vmatpush.bf16.msra.mxu3 %v705_v28 }
  0x1a   :  { %234 = vmatpush.bf16.msra.mxu2 %v696_v15 }
  0x1b   :  { %150 = vmatpush.bf16.msra.mxu1 %v687_v8 }
  0x1c   :  { %403 = vmatpush.bf16.msrb.mxu0 %v713_v42 }
  0x1d   :  { %319 = vmatpush.bf16.msra.mxu3 %v704_v29 }
  0x1e   :  { %235 = vmatpush.bf16.msra.mxu2 %v695_v22 }
  0x1f   :  { %151 = vmatpush.bf16.msra.mxu1 %v686_v9  ;;  %v734_v9 = vld [vmem:[%s903_s6] ss:$0 sm:$0xff] }
  0x20   :  { %404 = vmatpush.bf16.msrb.mxu0 %v712_v43 }
  0x21   :  { %320 = vmatpush.bf16.msra.mxu3 %v703_v36 }
  0x22   :  { %236 = vmatpush.bf16.msra.mxu2 %v694_v23 }
  0x23   :  { %152 = vmatpush.bf16.msra.mxu1 %v685_v10 }
  0x24   :  { %405 = vmatpush.bf16.msrb.mxu0 %v711_v50 }
  0x25   :  { %321 = vmatpush.bf16.msra.mxu3 %v702_v37 }
  0x26   :  { %237 = vmatpush.bf16.msra.mxu2 %v693_v24 }
  0x27   :  { %483 = vmatpush.bf16.msrb.mxu1 %v724_v53 }
  0x28   :  { %406 = vmatpush.bf16.msrb.mxu0 %v710_v51 }
  0x29   :  { %322 = vmatpush.bf16.msra.mxu3 %v701_v38 }
  0x2b   :  { %484 = vmatpush.bf16.msrb.mxu1 %v723_v54 }
  0x2c   :  { %407 = vmatpush.bf16.msrb.mxu0 %v709_v52 }
  0x2f   :  { %485 = vmatpush.bf16.msrb.mxu1 %v722_v55 }
  0x33   :  { %486 = vmatpush.bf16.msrb.mxu1 %v721_v56 }
  0x37   :  { %487 = vmatpush.bf16.msrb.mxu1 %v720_v57 }
  0x3b   :  { %488 = vmatpush.bf16.msrb.mxu1 %v719_v0 }
  0x3f   :  { %489 = vmatpush.bf16.msrb.mxu1 %v718_v1 }
  0x43   :  { %490 = vmatpush.bf16.msrb.mxu1 %v717_v2 }
  0x87   :  { %v71_v17 = vpop.f32.mrf.mxu0 }
  0x88   :  { %v72_v18 = vadd.f32 %v729_v16, %v71_v17 }
  0x8a   :  { %735 = vtanh.f32 %v72_v18 }
  0x8f   :  { %v73_v19 = vpop.f32.mrf.mxu0 }
  0x90   :  { %v736_v20 = vpop.eup %735 }
  0x91   :  { %v76_v21 = vpack.c.bf16 %v736_v20, %v736_v20 }
  0x93   :  { %153 = vmatmul.bf16.vlgmr.msra.gmra.mxu1 %v76_v21 }
 0x110   :  { %v154_v31 = vpop.f32.mrf.mxu1 }
 0x111   :  { %v155_v32 = vadd.f32 %v730_v30, %v154_v31 }
 0x113   :  { %737 = vtanh.f32 %v155_v32 }
 0x118   :  { %v156_v33 = vpop.f32.mrf.mxu1 }
 0x119   :  { %v738_v34 = vpop.eup %737 }
 0x11a   :  { %v159_v35 = vpack.c.bf16 %v738_v34, %v738_v34 }
 0x11c   :  { %238 = vmatmul.bf16.vlgmr.msra.gmra.mxu2 %v159_v35 }
 0x19f   :  { %v239_v45 = vpop.f32.mrf.mxu2 }
 0x1a0   :  { %v240_v46 = vadd.f32 %v731_v44, %v239_v45 }
 0x1a2   :  { %739 = vtanh.f32 %v240_v46 }
 0x1a7   :  { %v241_v47 = vpop.f32.mrf.mxu2 }
 0x1a8   :  { %v740_v48 = vpop.eup %739 }
 0x1a9   :  { %v244_v49 = vpack.c.bf16 %v740_v48, %v740_v48 }
 0x1ab   :  { %323 = vmatmul.bf16.vlgmr.msra.gmra.mxu3 %v244_v49 }
 0x22e   :  { %v324_v59 = vpop.f32.mrf.mxu3 }
 0x22f   :  { %v325_v60 = vadd.f32 %v732_v58, %v324_v59 }
 0x231   :  { %741 = vtanh.f32 %v325_v60 }
 0x236   :  { %v326_v61 = vpop.f32.mrf.mxu3 }
 0x237   :  { %v742_v62 = vpop.eup %741 }
 0x238   :  { %v329_v63 = vpack.c.bf16 %v742_v62, %v742_v62 }
 0x23a   :  { %408 = vmatmul.bf16.vlgmr.msrb.gmra.mxu0 %v329_v63 }
 0x2b7   :  { %v409_v4 = vpop.f32.mrf.mxu0 }
 0x2b8   :  { %v410_v5 = vadd.f32 %v733_v3, %v409_v4 }
 0x2ba   :  { %743 = vtanh.f32 %v410_v5 }
 0x2bf   :  { %v411_v6 = vpop.f32.mrf.mxu0 }
 0x2c0   :  { %v744_v7 = vpop.eup %743 }
 0x2c1   :  { %v414_v8 = vpack.c.bf16 %v744_v7, %v744_v7 }
 0x2c3   :  { %491 = vmatmul.bf16.vlgmr.msrb.gmra.mxu1 %v414_v8 }
 0x340   :  { %v492_v10 = vpop.f32.mrf.mxu1 }
 0x341   :  { %v493_v11 = vadd.f32 %v734_v9, %v492_v10 }
 0x343   :  { %745 = vtanh.f32 %v493_v11 }
 0x348   :  { %v494_v12 = vpop.f32.mrf.mxu1 }
 0x349   :  { %v746_v13 = vpop.eup %745 }
 0x34a   :  { %498 = vst.msk [vmem:[#allocation5] sm:$0xff] %vm497_vm1, %v746_v13 }
 0x34b   :  { %509 = dma.vmem_to_hbm [thread:$0]  %s505_s1, 128, %s507_s5, [#allocation4]  }
 0x34c   :  { %797 = dma.done.wait [#allocation4], 128  }
 0x34d   :  { %798 = vsyncadd [#allocation4], 4294967168 }
 0x34e   :  { %514 = vsyncpa [#allocation3], 1 }
 0x34f   :  { %515 = vsyncpa [#allocation4], 1 }

</bundles_post_ra>
